<compile_context>
chip_gen: v6e
topology: v6e:2x2x1
jax: 0.10.0
libtpu: 0.0.40
codegen_flags: <defaults>
</compile_context>

<pallas_src>
import jax
import jax.numpy as jnp
from jax.experimental import pallas as pl
from jax.experimental.pallas import tpu as pltpu

EMB_LEN = 32          # embedding width
CNN_OUT = 256         # conv output channels
FEAT_DIM = 205        # raw feature width
DENSE_SIZE = 512      # feature-MLP hidden width
KSIZE = 3             # single-kernel-size branches use kernel_size = 3

FEAT_PAD = 256        # feats lane-padded: 205 real cols + 1 ones col (b1 fold) -> 256
NPAD = 128            # n_labels lane-padded 5 -> 128
XCOL = 128            # per-branch im2col width: K*EMB_LEN (=96) + 1 bias col -> 128

SINGLE_KERNEL_BRANCHES = ["DVMA", "DVSA", "DVEX", "DVL2"]


def _round_up(x, m):
    return ((x + m - 1) // m) * m


def _pad_cols(a, width):
    return jnp.pad(a, ((0, 0), (0, width - a.shape[1])))


# ----------------------------------------------------------------------------
# Fused kernel.  grid = (batch_tiles, n_branches); the branch axis is the
# reduction (output block resident across it).
#   br == 0 : out <- feat-MLP contribution + fused bias
#   each br : out += pooled_br @ wdf_br   (conv-as-matmul, relu, time max-pool)
# Matmul operands are bf16 (MXU native); accumulation / elementwise in f32.
# ----------------------------------------------------------------------------
def _make_kernel(b_tile, t_pad):
    def kernel(feats_ref, w1_ref, w2f_ref, bias_ref, x_ref, wc_ref, wdf_ref, out_ref):
        br = pl.program_id(1)

        @pl.when(br == 0)
        def _():
            # feature MLP; b1 folded via the ones column of feats, (b2, branch
            # biases, final bias, 1/n mean) folded into bias_ref, and the final
            # Linear folded into w2f.
            x = jnp.maximum(feats_ref[...], 0.0).astype(jnp.bfloat16)
            h = jnp.dot(x, w1_ref[...], preferred_element_type=jnp.float32)
            hr = jnp.maximum(h, 0.0).astype(jnp.bfloat16)
            out_ref[...] = (jnp.dot(hr, w2f_ref[...],
                                    preferred_element_type=jnp.float32)
                            + bias_ref[...])

        # conv branch: im2col matmul (conv bias folded via ones column), relu,
        # global max-pool over time.  Zero-padded time/batch rows are exactly 0,
        # so the pool stays exact without masking.
        y = jnp.dot(x_ref[...], wc_ref[...], preferred_element_type=jnp.float32)
        y = jnp.maximum(y, 0.0)
        pooled = jnp.max(y.reshape(b_tile, t_pad, CNN_OUT), axis=1)   # [b_tile, 256]
        # relu(pooled) is a no-op (pooled >= 0); branch dense + final Linear +
        # 1/n mean are all folded into wdf.
        out_ref[...] += jnp.dot(pooled.astype(jnp.bfloat16), wdf_ref[...],
                                preferred_element_type=jnp.float32)

    return kernel


def _fused_forward_call(feats_pad, w1, w2f, bias, x_stack, wc, wdf,
                        *, b_pad, b_tile, t_pad, n_br):
    kernel = _make_kernel(b_tile, t_pad)
    grid = (b_pad // b_tile, n_br)
    return pl.pallas_call(
        kernel,
        out_shape=jax.ShapeDtypeStruct((b_pad, NPAD), jnp.float32),
        grid=grid,
        in_specs=[
            pl.BlockSpec((b_tile, FEAT_PAD), lambda bi, br: (bi, 0)),          # feats
            pl.BlockSpec((FEAT_PAD, DENSE_SIZE), lambda bi, br: (0, 0)),       # w1 (+b1)
            pl.BlockSpec((DENSE_SIZE, NPAD), lambda bi, br: (0, 0)),           # w2@wf/n
            pl.BlockSpec((1, NPAD), lambda bi, br: (0, 0)),                    # fused bias
            pl.BlockSpec((None, b_tile * t_pad, XCOL), lambda bi, br: (br, bi, 0)),  # im2col
            pl.BlockSpec((None, XCOL, CNN_OUT), lambda bi, br: (br, 0, 0)),    # conv w (+bc)
            pl.BlockSpec((None, CNN_OUT, NPAD), lambda bi, br: (br, 0, 0)),    # wd@wf/n
        ],
        out_specs=pl.BlockSpec((b_tile, NPAD), lambda bi, br: (bi, 0)),
        compiler_params=pltpu.CompilerParams(
            dimension_semantics=("parallel", "arbitrary")),
    )(feats_pad, w1, w2f, bias, x_stack, wc, wdf)


# ----------------------------------------------------------------------------
# Parameter packing (done once, outside the hot path)
# ----------------------------------------------------------------------------
def pack_params(NN_params, params, n_labels):
    """Pad / fold raw parameters once into the layout the fused kernel consumes."""
    # TODO(synk): FAKE/SQ (kernel_sizes [3,4,5]) concat 3*256 features but the
    # reference dense layer is Linear(256, n_labels) -> shape error even in
    # PyTorch; those branches are left unimplemented.
    active = tuple(n for n in SINGLE_KERNEL_BRANCHES if NN_params.get(n, False))
    n_br = len(active)
    if n_br == 0:
        # TODO(synk): feats-only configuration would need a branch-free kernel variant.
        raise NotImplementedError("at least one single-kernel CNN branch must be active")
    inv_n = 1.0 / float(n_br + 1)
    kc = KSIZE * EMB_LEN                                        # 96

    wf = params["final_w"]                                      # [n_labels, n_labels]
    bf = params["final_b"]                                      # [1, n_labels]

    # dense1 weight with b1 folded in as row FEAT_DIM (matches the ones column
    # injected into the padded feats).
    w1_aug = jnp.zeros((FEAT_PAD, DENSE_SIZE), jnp.float32)
    w1_aug = w1_aug.at[:FEAT_DIM, :].set(params["feat_w1"])
    w1_aug = w1_aug.at[FEAT_DIM, :].set(params["feat_b1"][0])

    # fold (final Linear, 1/n ensemble mean) into every head's output projection.
    w2f = (params["feat_w2"] @ wf) * inv_n                      # [512, n_labels]

    bias_sum = params["feat_b2"]
    wc_blocks, wdf_blocks = [], []
    for name in active:
        p = params[name]
        # conv weight [K, C_in, C_out] -> [K*C_in, C_out]; conv bias as row 96.
        blk = jnp.concatenate([p["wc"].reshape(kc, CNN_OUT), p["bc"]], axis=0)
        blk = jnp.pad(blk, ((0, XCOL - (kc + 1)), (0, 0)))      # [128, 256]
        wc_blocks.append(blk)
        wdf_blocks.append(_pad_cols((p["wd"] @ wf) * inv_n, NPAD))
        bias_sum = bias_sum + p["bd"]
    bias_total = _pad_cols((bias_sum * inv_n) @ wf + bf, NPAD)  # [1, NPAD], f32

    return {
        "active": active,
        "n_labels": n_labels,
        "w1": w1_aug.astype(jnp.bfloat16),                      # [256, 512]
        "w2f": _pad_cols(w2f, NPAD).astype(jnp.bfloat16),       # [512, 128]
        "bias": bias_total,                                     # [1, 128] f32
        "wc": jnp.stack(wc_blocks, axis=0).astype(jnp.bfloat16),    # [n_br, 128, 256]
        "wdf": jnp.stack(wdf_blocks, axis=0).astype(jnp.bfloat16),  # [n_br, 256, 128]
        "embs": {name: params[name]["emb"] for name in active},
    }


# ----------------------------------------------------------------------------
# Full forward (embedding gather + im2col glue in plain JAX, rest fused)
# ----------------------------------------------------------------------------
def penta_shallow_ensemble_forward(packed, encodings, feats):
    active = packed["active"]
    n_br = len(active)
    batch = feats.shape[0]
    seq_len = encodings[active[0]].shape[1]
    t = seq_len - KSIZE + 1                       # 'valid' conv output length
    t_pad = _round_up(t, 8)                       # sublane-align the time axis
    b_tile = min(64, _round_up(batch, 8))         # modest tile (v7x VMEM budget)
    b_pad = _round_up(batch, b_tile)

    # feats padded to 256 lanes; column FEAT_DIM carries a 1.0 so dense1's bias
    # is applied by the matmul itself (the 1.0 survives the leading relu).
    feats_pad = jnp.zeros((b_pad, FEAT_PAD), jnp.float32)
    feats_pad = feats_pad.at[:batch, :FEAT_DIM].set(feats)
    feats_pad = feats_pad.at[:batch, FEAT_DIM].set(1.0)

    # im2col glue per branch: [B, t, K*EMB+1] (trailing ones column carries the
    # conv bias), zero-padded to [Bp, Tp, 128]; branches stacked on a leading
    # axis the kernel's branch grid dimension indexes.
    # TODO(synk): building im2col in-kernel from the raw embeddings would cut a
    # further ~3x of activation HBM traffic.
    ones_col = jnp.ones((batch, t, 1), jnp.float32)
    cols = []
    for name in active:
        xe = jnp.take(packed["embs"][name], encodings[name], axis=0)     # [B, L, 32]
        shifted = [xe[:, dk:dk + t, :] for dk in range(KSIZE)]
        xcol = jnp.concatenate(shifted + [ones_col], axis=2)             # [B, t, 97]
        xcol = jnp.pad(xcol, ((0, b_pad - batch), (0, t_pad - t),
                              (0, XCOL - (KSIZE * EMB_LEN + 1))))        # [Bp, Tp, 128]
        cols.append(xcol.reshape(b_pad * t_pad, XCOL))
    x_stack = jnp.stack(cols, axis=0).astype(jnp.bfloat16)               # [n_br, Bp*Tp, 128]

    out_pad = _fused_forward_call(
        feats_pad, packed["w1"], packed["w2f"], packed["bias"],
        x_stack, packed["wc"], packed["wdf"],
        b_pad=b_pad, b_tile=b_tile, t_pad=t_pad, n_br=n_br)
    return out_pad[:batch, :packed["n_labels"]]


# ----------------------------------------------------------------------------
# Deterministic parameter init + pure-JAX (f32) reference
# ----------------------------------------------------------------------------
def _init_linear(key, fan_in, fan_out):
    k1, k2 = jax.random.split(key)
    bound = 1.0 / float(fan_in) ** 0.5
    w = jax.random.uniform(k1, (fan_in, fan_out), jnp.float32, -bound, bound)
    b = jax.random.uniform(k2, (1, fan_out), jnp.float32, -bound, bound)
    return w, b


def _init_conv(key, k, c_in, c_out):
    k1, k2 = jax.random.split(key)
    bound = 1.0 / float(c_in * k) ** 0.5
    w = jax.random.uniform(k1, (k, c_in, c_out), jnp.float32, -bound, bound)
    b = jax.random.uniform(k2, (1, c_out), jnp.float32, -bound, bound)
    return w, b


def make_params(key, vocab_lens, n_labels):
    keys = jax.random.split(key, 8)
    params = {}
    params["feat_w1"], params["feat_b1"] = _init_linear(keys[0], FEAT_DIM, DENSE_SIZE)
    params["feat_w2"], params["feat_b2"] = _init_linear(keys[1], DENSE_SIZE, n_labels)
    params["final_w"], params["final_b"] = _init_linear(keys[2], n_labels, n_labels)
    for i, name in enumerate(SINGLE_KERNEL_BRANCHES):
        bk = jax.random.split(keys[3 + i], 3)
        emb = jax.random.normal(bk[0], (vocab_lens[name], EMB_LEN), jnp.float32)
        wc, bc = _init_conv(bk[1], KSIZE, EMB_LEN, CNN_OUT)
        wd, bd = _init_linear(bk[2], CNN_OUT, n_labels)
        params[name] = {"emb": emb, "wc": wc, "bc": bc, "wd": wd, "bd": bd}
    return params


def reference_forward(NN_params, encodings, feats, params):
    h = jnp.maximum(feats, 0.0) @ params["feat_w1"] + params["feat_b1"]
    f = jnp.maximum(h, 0.0) @ params["feat_w2"] + params["feat_b2"]
    outs = [f]
    for name in SINGLE_KERNEL_BRANCHES:
        if NN_params.get(name, False):
            p = params[name]
            xe = jnp.take(p["emb"], encodings[name], axis=0)    # [B, L, 32]
            K = p["wc"].shape[0]
            T = xe.shape[1] - K + 1
            acc = jnp.broadcast_to(p["bc"], (xe.shape[0], T, CNN_OUT))
            for dk in range(K):
                acc = acc + jnp.einsum("btc,co->bto", xe[:, dk:dk + T, :], p["wc"][dk])
            pooled = jnp.max(jnp.maximum(acc, 0.0), axis=1)
            outs.append(jnp.maximum(pooled, 0.0) @ p["wd"] + p["bd"])
    m = jnp.mean(jnp.stack(outs, axis=0), axis=0)
    return m @ params["final_w"] + params["final_b"]


if __name__ == "__main__":
    B, L = 2, 16
    n_labels = 5
    vocab_lens = {"DVMA": 50, "DVSA": 60, "DVEX": 70, "DVL2": 80}
    NN_params = {"FAKE": False, "SQ": False,
                 "DVMA": True, "DVSA": True, "DVEX": True, "DVL2": True}

    key = jax.random.PRNGKey(0)
    kp, kf, *kenc = jax.random.split(key, 2 + len(SINGLE_KERNEL_BRANCHES))
    params = make_params(kp, vocab_lens, n_labels)
    feats = jax.random.normal(kf, (B, FEAT_DIM), jnp.float32)
    encodings = {
        name: jax.random.randint(kenc[i], (B, L), 0, vocab_lens[name])
        for i, name in enumerate(SINGLE_KERNEL_BRANCHES)
    }

    packed = pack_params(NN_params, params, n_labels)
    fwd = jax.jit(lambda enc, f: penta_shallow_ensemble_forward(packed, enc, f))
    out = jax.block_until_ready(fwd(encodings, feats))

    ref = jax.block_until_ready(reference_forward(NN_params, encodings, feats, params))
    assert out.shape == (B, n_labels), out.shape
    # bf16 MXU operands vs the exact-f32 reference -> loosened tolerance.
    assert jnp.allclose(out, ref, atol=5e-2, rtol=5e-2), (out, ref)

    print("KERNEL_OK")
</pallas_src>

<mosaic_0001>
module attributes {stable_mosaic.version = 11 : i64} {
  func.func @kernel(%arg0: i32, %arg1: i32, %arg2: memref<8x256xf32, #tpu.memory_space<vmem>>, %arg3: memref<256x512xbf16, #tpu.memory_space<vmem>>, %arg4: memref<512x128xbf16, #tpu.memory_space<vmem>>, %arg5: memref<1x128xf32, #tpu.memory_space<vmem>>, %arg6: memref<1x128x128xbf16, #tpu.memory_space<vmem>>, %arg7: memref<1x128x256xbf16, #tpu.memory_space<vmem>>, %arg8: memref<1x256x128xbf16, #tpu.memory_space<vmem>>, %arg9: memref<8x128xf32, #tpu.memory_space<vmem>>) attributes {dimension_semantics = [#tpu.dimension_semantics<parallel>, #tpu.dimension_semantics<arbitrary>], iteration_bounds = array<i64: 1, 4>, scalar_prefetch = 0 : i64, scratch_operands = 0 : i64, tpu.core_type = #tpu.core_type<tc>, window_params = [{transform_indices = @transform_0, window_bounds = array<i64: 8, 256>}, {pipeline_mode = #tpu.pipeline_mode<synchronous>, transform_indices = @transform_1, window_bounds = array<i64: 256, 512>}, {pipeline_mode = #tpu.pipeline_mode<synchronous>, transform_indices = @transform_2, window_bounds = array<i64: 512, 128>}, {pipeline_mode = #tpu.pipeline_mode<synchronous>, transform_indices = @transform_3, window_bounds = array<i64: 1, 128>}, {transform_indices = @transform_4, window_bounds = array<i64: 1, 128, 128>}, {transform_indices = @transform_5, window_bounds = array<i64: 1, 128, 256>}, {transform_indices = @transform_6, window_bounds = array<i64: 1, 256, 128>}, {transform_indices = @transform_7, window_bounds = array<i64: 8, 128>}]} {
    %c0_i32 = arith.constant 0 : i32
    %0 = arith.cmpi eq, %arg1, %c0_i32 : i32
    %1 = arith.extui %0 : i1 to i32
    %c0_i32_0 = arith.constant 0 : i32
    %2 = arith.cmpi ne, %1, %c0_i32_0 : i32
    scf.if %2 {
      %c0_16 = arith.constant 0 : index
      %c0_17 = arith.constant 0 : index
      %19 = vector.load %arg2[%c0_16, %c0_17] : memref<8x256xf32, #tpu.memory_space<vmem>>, vector<8x256xf32>
      %cst_18 = arith.constant 0.000000e+00 : f32
      %20 = vector.broadcast %cst_18 : f32 to vector<8x256xf32>
      %21 = arith.maximumf %19, %20 : vector<8x256xf32>
      %22 = arith.truncf %21 : vector<8x256xf32> to vector<8x256xbf16>
      %c0_19 = arith.constant 0 : index
      %c0_20 = arith.constant 0 : index
      %23 = vector.load %arg3[%c0_19, %c0_20] : memref<256x512xbf16, #tpu.memory_space<vmem>>, vector<256x512xbf16>
      %cst_21 = arith.constant dense<0.000000e+00> : vector<8x512xf32>
      %24 = tpu.matmul %22, %23, %cst_21 {dimension_numbers = #tpu.dot_dimension_numbers<[1], [0], [0], [1], [0, 0, 1, 1], [], []>} : vector<8x256xbf16>, vector<256x512xbf16>, vector<8x512xf32> -> vector<8x512xf32>
      %cst_22 = arith.constant 0.000000e+00 : f32
      %25 = vector.broadcast %cst_22 : f32 to vector<8x512xf32>
      %26 = arith.maximumf %24, %25 : vector<8x512xf32>
      %27 = arith.truncf %26 : vector<8x512xf32> to vector<8x512xbf16>
      %c0_23 = arith.constant 0 : index
      %c0_24 = arith.constant 0 : index
      %28 = vector.load %arg4[%c0_23, %c0_24] : memref<512x128xbf16, #tpu.memory_space<vmem>>, vector<512x128xbf16>
      %cst_25 = arith.constant dense<0.000000e+00> : vector<8x128xf32>
      %29 = tpu.matmul %27, %28, %cst_25 {dimension_numbers = #tpu.dot_dimension_numbers<[1], [0], [0], [1], [0, 0, 1, 1], [], []>} : vector<8x512xbf16>, vector<512x128xbf16>, vector<8x128xf32> -> vector<8x128xf32>
      %c0_26 = arith.constant 0 : index
      %c0_27 = arith.constant 0 : index
      %30 = vector.load %arg5[%c0_26, %c0_27] : memref<1x128xf32, #tpu.memory_space<vmem>>, vector<1x128xf32>
      %31 = vector.broadcast %30 : vector<1x128xf32> to vector<8x128xf32>
      %32 = arith.addf %29, %31 : vector<8x128xf32>
      %c0_28 = arith.constant 0 : index
      %c0_29 = arith.constant 0 : index
      %33 = vector.load %arg9[%c0_28, %c0_29] : memref<8x128xf32, #tpu.memory_space<vmem>>, vector<8x128xf32>
      tpu.vector_store %arg9[%c0_28, %c0_29], %32 {strides = array<i32>} : memref<8x128xf32, #tpu.memory_space<vmem>>, vector<8x128xf32>,
    } else {
    }
    %c0 = arith.constant 0 : index
    %c0_1 = arith.constant 0 : index
    %c0_2 = arith.constant 0 : index
    %3 = vector.load %arg6[%c0, %c0_1, %c0_2] : memref<1x128x128xbf16, #tpu.memory_space<vmem>>, vector<1x128x128xbf16>
    %4 = vector.shape_cast %3 : vector<1x128x128xbf16> to vector<128x128xbf16>
    %c0_3 = arith.constant 0 : index
    %c0_4 = arith.constant 0 : index
    %c0_5 = arith.constant 0 : index
    %5 = vector.load %arg7[%c0_3, %c0_4, %c0_5] : memref<1x128x256xbf16, #tpu.memory_space<vmem>>, vector<1x128x256xbf16>
    %6 = vector.shape_cast %5 : vector<1x128x256xbf16> to vector<128x256xbf16>
    %cst = arith.constant dense<0.000000e+00> : vector<128x256xf32>
    %7 = tpu.matmul %4, %6, %cst {dimension_numbers = #tpu.dot_dimension_numbers<[1], [0], [0], [1], [0, 0, 1, 1], [], []>} : vector<128x128xbf16>, vector<128x256xbf16>, vector<128x256xf32> -> vector<128x256xf32>
    %cst_6 = arith.constant 0.000000e+00 : f32
    %8 = vector.broadcast %cst_6 : f32 to vector<128x256xf32>
    %9 = arith.maximumf %7, %8 : vector<128x256xf32>
    %10 = vector.shape_cast %9 : vector<128x256xf32> to vector<8x16x256xf32>
    %cst_7 = arith.constant dense<0xFF800000> : vector<8x256xf32>
    %11 = vector.multi_reduction <maximumf>, %10, %cst_7 [1] : vector<8x16x256xf32> to vector<8x256xf32>
    %c0_8 = arith.constant 0 : index
    %c0_9 = arith.constant 0 : index
    %12 = vector.load %arg9[%c0_8, %c0_9] : memref<8x128xf32, #tpu.memory_space<vmem>>, vector<8x128xf32>
    %13 = arith.truncf %11 : vector<8x256xf32> to vector<8x256xbf16>
    %c0_10 = arith.constant 0 : index
    %c0_11 = arith.constant 0 : index
    %c0_12 = arith.constant 0 : index
    %14 = vector.load %arg8[%c0_10, %c0_11, %c0_12] : memref<1x256x128xbf16, #tpu.memory_space<vmem>>, vector<1x256x128xbf16>
    %15 = vector.shape_cast %14 : vector<1x256x128xbf16> to vector<256x128xbf16>
    %cst_13 = arith.constant dense<0.000000e+00> : vector<8x128xf32>
    %16 = tpu.matmul %13, %15, %cst_13 {dimension_numbers = #tpu.dot_dimension_numbers<[1], [0], [0], [1], [0, 0, 1, 1], [], []>} : vector<8x256xbf16>, vector<256x128xbf16>, vector<8x128xf32> -> vector<8x128xf32>
    %17 = arith.addf %12, %16 : vector<8x128xf32>
    %c0_14 = arith.constant 0 : index
    %c0_15 = arith.constant 0 : index
    %18 = vector.load %arg9[%c0_14, %c0_15] : memref<8x128xf32, #tpu.memory_space<vmem>>, vector<8x128xf32>
    tpu.vector_store %arg9[%c0_14, %c0_15], %17 {strides = array<i32>} : memref<8x128xf32, #tpu.memory_space<vmem>>, vector<8x128xf32>,
    return
  }
  func.func @transform_0(%arg0: i32, %arg1: i32) -> (i32, i32) {
    %c0_i32 = arith.constant 0 : i32
    %c0_i32_0 = arith.constant 0 : i32
    return %arg0, %c0_i32 : i32, i32
  }
  func.func @transform_1(%arg0: i32, %arg1: i32) -> (i32, i32) {
    %c0_i32 = arith.constant 0 : i32
    %c0_i32_0 = arith.constant 0 : i32
    %c0_i32_1 = arith.constant 0 : i32
    return %c0_i32, %c0_i32_0 : i32, i32
  }
  func.func @transform_2(%arg0: i32, %arg1: i32) -> (i32, i32) {
    %c0_i32 = arith.constant 0 : i32
    %c0_i32_0 = arith.constant 0 : i32
    %c0_i32_1 = arith.constant 0 : i32
    return %c0_i32, %c0_i32_0 : i32, i32
  }
  func.func @transform_3(%arg0: i32, %arg1: i32) -> (i32, i32) {
    %c0_i32 = arith.constant 0 : i32
    %c0_i32_0 = arith.constant 0 : i32
    %c0_i32_1 = arith.constant 0 : i32
    return %c0_i32, %c0_i32_0 : i32, i32
  }
  func.func @transform_4(%arg0: i32, %arg1: i32) -> (i32, i32, i32) {
    %c0_i32 = arith.constant 0 : i32
    %c0_i32_0 = arith.constant 0 : i32
    return %arg1, %arg0, %c0_i32 : i32, i32, i32
  }
  func.func @transform_5(%arg0: i32, %arg1: i32) -> (i32, i32, i32) {
    %c0_i32 = arith.constant 0 : i32
    %c0_i32_0 = arith.constant 0 : i32
    %c0_i32_1 = arith.constant 0 : i32
    return %arg1, %c0_i32, %c0_i32_0 : i32, i32, i32
  }
  func.func @transform_6(%arg0: i32, %arg1: i32) -> (i32, i32, i32) {
    %c0_i32 = arith.constant 0 : i32
    %c0_i32_0 = arith.constant 0 : i32
    %c0_i32_1 = arith.constant 0 : i32
    return %arg1, %c0_i32, %c0_i32_0 : i32, i32, i32
  }
  func.func @transform_7(%arg0: i32, %arg1: i32) -> (i32, i32) {
    %c0_i32 = arith.constant 0 : i32
    %c0_i32_0 = arith.constant 0 : i32
    return %arg0, %c0_i32 : i32, i32
  }
}

</mosaic_0001>

<bundles_post_ra>
// kernel: _lambda_.1
= control target key start
LH: loop header
LB: loop body
LE: loop exit
PB: predicated region body
PF: predicated region fallthrough
CT: control target
= control target key end

     0   :  { %s2446_s24 = smov 0   ;;  %s2448_s25 = smov 0   ;;  %s2852_s0 = inlined_call_operand.vmem [shape: f32[8,256], index: 0, kind: input, shape index: {}]   ;;  %s2853_s1 = inlined_call_operand.vmem [shape: bf16[256,512], index: 1, kind: input, shape index: {}]   ;;  %s2854_s2 = inlined_call_operand.vmem [shape: bf16[512,128], index: 2, kind: input, shape index: {}]   ;;  %s2855_s3 = inlined_call_operand.vmem [shape: f32[1,128], index: 3, kind: input, shape index: {}]   ;;  %s2856_s4 = inlined_call_operand.vmem [shape: bf16[4,128,128], index: 4, kind: input, shape index: {}]   ;;  %s2857_s5 = inlined_call_operand.vmem [shape: bf16[4,128,256], index: 5, kind: input, shape index: {}]   ;;  %s2858_s6 = inlined_call_operand.vmem [shape: bf16[4,256,128], index: 6, kind: input, shape index: {}]   ;;  %s2859_s7 = inlined_call_operand.vmem [shape: f32[8,128], index: 7, kind: output, shape index: {}]  }
   0x1   :  { %s2450_s26 = smov 0  }
   0x2 LB: > { %s26_s27 = sadd.s32 1, %s2399_s25  ;;  %p1963_p0 = scmp.ge.s32.totalorder %s2403_s26, 1  ;;  %s2403_s26 = sphi %s2450_s26, %s17_s26   ;;  %s2399_s25 = sphi %s2448_s25, %s2861_s25   ;;  %s2395_s24 = sphi %s2446_s24, %s2860_s24  }
   0x3   : > { %p27_p1 = scmp.ge.s32.totalorder %s26_s27, 4  ;;  %p286_p2 = scmp.lt.s32.totalorder %s2403_s26, 5 }
   0x5   : > { %s2863_s27 = smov (%p27_p1, %s26_s27), 0  ;;  %p287_p3 = pnand %p1963_p0, %p286_p2 }
   0x6   : > { %p342_p4 = scmp.lt.s32.totalorder (!%p287_p3), %s2395_s24, 3  ;;  %p1970_p5 = scmp.ne.s32.totalorder (!%p287_p3), %s2395_s24, 0 }
   0x7   : > { %290 = sbr.rel (%p287_p3) target bundleno = 997 (0x3e5), region = 48 }
   0xc   : > { %s343_s28 = scalar_select %p342_p4, %s2395_s24, 3 }
   0xd   : > { %369 = sbr.rel (%p1970_p5) target bundleno = 485 (0x1e5), region = 52 }
   0xe   : > { %s2111_s29 = sshll.u32 %s343_s28, 6  ;;  %s2112_s30 = sshll.u32 %s343_s28, 7 }
   0xf   : > { %s2467_s10 = scalar_lea.vmem %s2856_s4, %s2111_s29  ;;  %s2472_s13 = scalar_lea.vmem %s2857_s5, %s2112_s30 }
  0x10   : > { %s2477_s16 = scalar_lea.vmem %s2858_s6, %s2112_s30 }
  0x12   : > { %v2205_v0 = vld [vmem:[%s2853_s1 + $0xe4] ss:$16 sps:$4 sm:$0xff]   ;;  %v2207_v1 = vld [vmem:[%s2853_s1 + $0xec] ss:$16 sps:$4 sm:$0xff]   ;;  %v2209_v2 = vld [vmem:[%s2853_s1 + $0xe0] ss:$16 sps:$4 sm:$0xff]  }
  0x13   : > { %760 = vmatprep.subr.bf16.mxu0 %v2205_v0  ;;  %v2210_v3 = vld [vmem:[%s2853_s1 + $0xe8] ss:$16 sps:$4 sm:$0xff]   ;;  %801 = vmatprep.subr.bf16.mxu1 %v2207_v1  ;;  %v2211_v4 = vld [vmem:[%s2853_s1 + $0xc4] ss:$16 sps:$4 sm:$0xff]   ;;  %v2213_v5 = vld [vmem:[%s2853_s1 + $0xcc] ss:$16 sps:$4 sm:$0xff]  }
  0x14   : > { %761 = vmatpush1.bf16.msra.mxu0 %v2209_v2  ;;  %802 = vmatpush1.bf16.msra.mxu1 %v2210_v3  ;;  %v2215_v6 = vld [vmem:[%s2853_s1 + $0xc0] ss:$16 sps:$4 sm:$0xff]   ;;  %v2216_v7 = vld [vmem:[%s2853_s1 + $0xc8] ss:$16 sps:$4 sm:$0xff]   ;;  %v2217_v8 = vld [vmem:[%s2853_s1 + $0xa4] ss:$16 sps:$4 sm:$0xff]  }
  0x15   : > { %762 = vmatprep.subr.bf16.mxu0 %v2211_v4  ;;  %803 = vmatprep.subr.bf16.mxu1 %v2213_v5  ;;  %v2219_v9 = vld [vmem:[%s2853_s1 + $0xac] ss:$16 sps:$4 sm:$0xff]   ;;  %v2221_v10 = vld [vmem:[%s2853_s1 + $0xa0] ss:$16 sps:$4 sm:$0xff]   ;;  %v2222_v11 = vld [vmem:[%s2853_s1 + $0xa8] ss:$16 sps:$4 sm:$0xff]  }
  0x16   : > { %v2223_v12 = vld [vmem:[%s2853_s1 + $0x84] ss:$16 sps:$4 sm:$0xff]   ;;  %v2225_v13 = vld [vmem:[%s2853_s1 + $0x8c] ss:$16 sps:$4 sm:$0xff]   ;;  %v2227_v14 = vld [vmem:[%s2853_s1 + $0x80] ss:$16 sps:$4 sm:$0xff]  }
  0x17   : > { %v2228_v15 = vld [vmem:[%s2853_s1 + $0x88] ss:$16 sps:$4 sm:$0xff]   ;;  %v2229_v16 = vld [vmem:[%s2853_s1 + $0x64] ss:$16 sps:$4 sm:$0xff]   ;;  %v2231_v17 = vld [vmem:[%s2853_s1 + $0x6c] ss:$16 sps:$4 sm:$0xff]  }
  0x18   : > { %763 = vmatpush1.bf16.msra.mxu0 %v2215_v6  ;;  %804 = vmatpush1.bf16.msra.mxu1 %v2216_v7  ;;  %v2233_v18 = vld [vmem:[%s2853_s1 + $0x60] ss:$16 sps:$4 sm:$0xff]   ;;  %v2234_v19 = vld [vmem:[%s2853_s1 + $0x68] ss:$16 sps:$4 sm:$0xff]   ;;  %v2235_v20 = vld [vmem:[%s2853_s1 + $0x44] ss:$16 sps:$4 sm:$0xff]  }
  0x19   : > { %764 = vmatprep.subr.bf16.mxu0 %v2217_v8  ;;  %805 = vmatprep.subr.bf16.mxu1 %v2219_v9  ;;  %v2237_v21 = vld [vmem:[%s2853_s1 + $0x4c] ss:$16 sps:$4 sm:$0xff]   ;;  %v2239_v22 = vld [vmem:[%s2853_s1 + $0x40] ss:$16 sps:$4 sm:$0xff]   ;;  %v2240_v23 = vld [vmem:[%s2853_s1 + $0x48] ss:$16 sps:$4 sm:$0xff]  }
  0x1a   : > { %v2241_v24 = vld [vmem:[%s2853_s1 + $0x24] ss:$16 sps:$4 sm:$0xff]   ;;  %v2243_v25 = vld [vmem:[%s2853_s1 + $0x2c] ss:$16 sps:$4 sm:$0xff]   ;;  %v2245_v26 = vld [vmem:[%s2853_s1 + $0x20] ss:$16 sps:$4 sm:$0xff]  }
  0x1b   : > { %v2246_v27 = vld [vmem:[%s2853_s1 + $0x28] ss:$16 sps:$4 sm:$0xff]   ;;  %v2247_v28 = vld [vmem:[%s2853_s1 + $0x4] ss:$16 sps:$4 sm:$0xff]   ;;  %v2249_v29 = vld [vmem:[%s2853_s1 + $0xc] ss:$16 sps:$4 sm:$0xff]  }
  0x1c   : > { %765 = vmatpush1.bf16.msra.mxu0 %v2221_v10  ;;  %806 = vmatpush1.bf16.msra.mxu1 %v2222_v11  ;;  %v2251_v30 = vld [vmem:[%s2853_s1] ss:$16 sps:$4 sm:$0xff]   ;;  %v2252_v31 = vld [vmem:[%s2853_s1 + $0x8] ss:$16 sps:$4 sm:$0xff]   ;;  %v2253_v32 = vld [vmem:[%s2853_s1 + $0x1e4] ss:$16 sps:$4 sm:$0xff]  }
  0x1d   : > { %766 = vmatprep.subr.bf16.mxu0 %v2223_v12  ;;  %807 = vmatprep.subr.bf16.mxu1 %v2225_v13  ;;  %v2255_v33 = vld [vmem:[%s2853_s1 + $0x1ec] ss:$16 sps:$4 sm:$0xff]   ;;  %v2257_v34 = vld [vmem:[%s2853_s1 + $0x1e0] ss:$16 sps:$4 sm:$0xff]   ;;  %v2258_v35 = vld [vmem:[%s2853_s1 + $0x1e8] ss:$16 sps:$4 sm:$0xff]  }
  0x1e   : > { %v2259_v36 = vld [vmem:[%s2853_s1 + $0x1c4] ss:$16 sps:$4 sm:$0xff]   ;;  %v2261_v37 = vld [vmem:[%s2853_s1 + $0x1cc] ss:$16 sps:$4 sm:$0xff]   ;;  %v2263_v38 = vld [vmem:[%s2853_s1 + $0x1c0] ss:$16 sps:$4 sm:$0xff]  }
  0x1f   : > { %v2264_v39 = vld [vmem:[%s2853_s1 + $0x1c8] ss:$16 sps:$4 sm:$0xff]   ;;  %v2265_v40 = vld [vmem:[%s2853_s1 + $0x1a4] ss:$16 sps:$4 sm:$0xff]   ;;  %v2267_v41 = vld [vmem:[%s2853_s1 + $0x1ac] ss:$16 sps:$4 sm:$0xff]  }
  0x20   : > { %767 = vmatpush1.bf16.msra.mxu0 %v2227_v14  ;;  %808 = vmatpush1.bf16.msra.mxu1 %v2228_v15  ;;  %v2269_v42 = vld [vmem:[%s2853_s1 + $0x1a0] ss:$16 sps:$4 sm:$0xff]   ;;  %v2270_v43 = vld [vmem:[%s2853_s1 + $0x1a8] ss:$16 sps:$4 sm:$0xff]   ;;  %v2271_v44 = vld [vmem:[%s2853_s1 + $0x184] ss:$16 sps:$4 sm:$0xff]  }
  0x21   : > { %768 = vmatprep.subr.bf16.mxu0 %v2229_v16  ;;  %809 = vmatprep.subr.bf16.mxu1 %v2231_v17  ;;  %v2273_v45 = vld [vmem:[%s2853_s1 + $0x18c] ss:$16 sps:$4 sm:$0xff]   ;;  %v2275_v46 = vld [vmem:[%s2853_s1 + $0x180] ss:$16 sps:$4 sm:$0xff]   ;;  %v2276_v47 = vld [vmem:[%s2853_s1 + $0x188] ss:$16 sps:$4 sm:$0xff]  }
  0x22   : > { %v371_v48 = vld [vmem:[%s2852_s0 + $0x8] sm:$0xff]  ;;  %v2277_v50 = vld [vmem:[%s2853_s1 + $0x164] ss:$16 sps:$4 sm:$0xff]   ;;  %v2281_v53 = vld [vmem:[%s2853_s1 + $0x160] ss:$16 sps:$4 sm:$0xff]  }
  0x23   : > { %v373_v49 = vmax.f32 %v371_v48, 0.0  ;;  %v2279_v51 = vld [vmem:[%s2853_s1 + $0x16c] ss:$16 sps:$4 sm:$0xff]   ;;  %v2282_v54 = vld [vmem:[%s2853_s1 + $0x168] ss:$16 sps:$4 sm:$0xff]   ;;  %v370_v0 = vld [vmem:[%s2852_s0] sm:$0xff] }
  0x24   : > { %769 = vmatpush1.bf16.msra.mxu0 %v2233_v18  ;;  %810 = vmatpush1.bf16.msra.mxu1 %v2234_v19  ;;  %v2283_v55 = vld [vmem:[%s2853_s1 + $0x144] ss:$16 sps:$4 sm:$0xff]   ;;  %v2285_v56 = vld [vmem:[%s2853_s1 + $0x14c] ss:$16 sps:$4 sm:$0xff]   ;;  %v2287_v57 = vld [vmem:[%s2853_s1 + $0x140] ss:$16 sps:$4 sm:$0xff]  }
  0x25   : > { %770 = vmatprep.subr.bf16.mxu0 %v2235_v20  ;;  %811 = vmatprep.subr.bf16.mxu1 %v2237_v21  ;;  %v375_v52 = vpack.c.bf16 %v373_v49, %v373_v49  ;;  %v2288_v58 = vld [vmem:[%s2853_s1 + $0x148] ss:$16 sps:$4 sm:$0xff]   ;;  %v2289_v59 = vld [vmem:[%s2853_s1 + $0x124] ss:$16 sps:$4 sm:$0xff]   ;;  %v2291_v60 = vld [vmem:[%s2853_s1 + $0x12c] ss:$16 sps:$4 sm:$0xff]  }
  0x26   : > { %v2293_v61 = vld [vmem:[%s2853_s1 + $0x120] ss:$16 sps:$4 sm:$0xff]   ;;  %v2294_v62 = vld [vmem:[%s2853_s1 + $0x128] ss:$16 sps:$4 sm:$0xff]   ;;  %v2295_v63 = vld [vmem:[%s2853_s1 + $0x104] ss:$16 sps:$4 sm:$0xff]  }
  0x27   : > { %792 = vmatprep.mubr.bf16.mxu0 %v375_v52  ;;  %833 = vmatprep.mubr.bf16.mxu1 %v375_v52  ;;  %v2297_v1 = vld [vmem:[%s2853_s1 + $0x10c] ss:$16 sps:$4 sm:$0xff]   ;;  %v2299_v2 = vld [vmem:[%s2853_s1 + $0x100] ss:$16 sps:$4 sm:$0xff]   ;;  %v2300_v3 = vld [vmem:[%s2853_s1 + $0x108] ss:$16 sps:$4 sm:$0xff]  }
  0x28   : > { %771 = vmatpush1.bf16.msra.mxu0 %v2239_v22  ;;  %812 = vmatpush1.bf16.msra.mxu1 %v2240_v23  ;;  %v372_v4 = vmax.f32 %v370_v0, 0.0  ;;  %v2301_v5 = vld [vmem:[%s2854_s2 + $0x78] sm:$0xff]   ;;  %v2305_v10 = vld [vmem:[%s2854_s2 + $0x70] sm:$0xff]   ;;  %v2309_v14 = vld [vmem:[%s2854_s2 + $0x68] sm:$0xff]  }
  0x29   : > { %772 = vmatprep.subr.bf16.mxu0 %v2241_v24  ;;  %813 = vmatprep.subr.bf16.mxu1 %v2243_v25  ;;  %v2302_v6 = vld [vmem:[%s2854_s2 + $0xf8] sm:$0xff]   ;;  %v2306_v11 = vld [vmem:[%s2854_s2 + $0xf0] sm:$0xff]   ;;  %v2310_v15 = vld [vmem:[%s2854_s2 + $0xe8] sm:$0xff]  }
  0x2a   : > { %v2303_v7 = vld [vmem:[%s2854_s2 + $0x38] sm:$0xff]   ;;  %v374_v8 = vpack.c.bf16 %v372_v4, %v372_v4  ;;  %v2307_v12 = vld [vmem:[%s2854_s2 + $0x30] sm:$0xff]   ;;  %v2311_v16 = vld [vmem:[%s2854_s2 + $0x28] sm:$0xff]  }
  0x2b   : > { %v2304_v9 = vld [vmem:[%s2854_s2 + $0xb8] sm:$0xff]   ;;  %v2308_v13 = vld [vmem:[%s2854_s2 + $0xb0] sm:$0xff]   ;;  %v2312_v17 = vld [vmem:[%s2854_s2 + $0xa8] sm:$0xff]  }
  0x2c   : > { %773 = vmatpush1.bf16.msra.mxu0 %v2245_v26  ;;  %814 = vmatpush1.bf16.msra.mxu1 %v2246_v27  ;;  %v2313_v18 = vld [vmem:[%s2854_s2 + $0x60] sm:$0xff]   ;;  %v2317_v22 = vld [vmem:[%s2854_s2 + $0x58] sm:$0xff]   ;;  %v2321_v26 = vld [vmem:[%s2854_s2 + $0x50] sm:$0xff]  }
  0x2d   : > { %774 = vmatprep.subr.bf16.mxu0 %v2247_v28  ;;  %815 = vmatprep.subr.bf16.mxu1 %v2249_v29  ;;  %v2314_v19 = vld [vmem:[%s2854_s2 + $0xe0] sm:$0xff]   ;;  %v2318_v23 = vld [vmem:[%s2854_s2 + $0xd8] sm:$0xff]   ;;  %v2322_v27 = vld [vmem:[%s2854_s2 + $0xd0] sm:$0xff]  }
  0x2e   : > { %v2315_v20 = vld [vmem:[%s2854_s2 + $0x20] sm:$0xff]   ;;  %v2319_v24 = vld [vmem:[%s2854_s2 + $0x18] sm:$0xff]   ;;  %v2323_v28 = vld [vmem:[%s2854_s2 + $0x10] sm:$0xff]  }
  0x2f   : > { %v2316_v21 = vld [vmem:[%s2854_s2 + $0xa0] sm:$0xff]   ;;  %v2320_v25 = vld [vmem:[%s2854_s2 + $0x98] sm:$0xff]   ;;  %v2324_v29 = vld [vmem:[%s2854_s2 + $0x90] sm:$0xff]  }
  0x30   : > { %775 = vmatpush1.bf16.msra.mxu0 %v2251_v30  ;;  %816 = vmatpush1.bf16.msra.mxu1 %v2252_v31  ;;  %v2325_v30 = vld [vmem:[%s2854_s2 + $0x48] sm:$0xff]  }
  0x31   : > { %776 = vmatprep.subr.bf16.mxu0 %v2253_v32  ;;  %817 = vmatprep.subr.bf16.mxu1 %v2255_v33  ;;  %v2326_v31 = vld [vmem:[%s2854_s2 + $0xc8] sm:$0xff]  }
  0x32   : > { %v2327_v32 = vld [vmem:[%s2854_s2 + $0x8] sm:$0xff]  }
  0x33   : > { %v2328_v33 = vld [vmem:[%s2854_s2 + $0x88] sm:$0xff]  }
  0x34   : > { %777 = vmatpush2.bf16.msra.mxu0 %v2257_v34  ;;  %818 = vmatpush2.bf16.msra.mxu1 %v2258_v35  ;;  %v2329_v34 = vld [vmem:[%s2854_s2 + $0x40] sm:$0xff]  }
  0x35   : > { %778 = vmatprep.subr.bf16.mxu0 %v2259_v36  ;;  %819 = vmatprep.subr.bf16.mxu1 %v2261_v37  ;;  %v2330_v35 = vld [vmem:[%s2854_s2 + $0xc0] sm:$0xff]  }
  0x36   : > { %v2331_v36 = vld [vmem:[%s2854_s2] sm:$0xff]  }
  0x37   : > { %v2332_v37 = vld [vmem:[%s2854_s2 + $0x80] sm:$0xff]  }
  0x38   : > { %779 = vmatpush2.bf16.msra.mxu0 %v2263_v38  ;;  %820 = vmatpush2.bf16.msra.mxu1 %v2264_v39 }
  0x39   : > { %780 = vmatprep.subr.bf16.mxu0 %v2265_v40  ;;  %821 = vmatprep.subr.bf16.mxu1 %v2267_v41 }
  0x3c   : > { %781 = vmatpush2.bf16.msra.mxu0 %v2269_v42  ;;  %822 = vmatpush2.bf16.msra.mxu1 %v2270_v43 }
  0x3d   : > { %782 = vmatprep.subr.bf16.mxu0 %v2271_v44  ;;  %823 = vmatprep.subr.bf16.mxu1 %v2273_v45 }
  0x40   : > { %783 = vmatpush2.bf16.msra.mxu0 %v2275_v46  ;;  %824 = vmatpush2.bf16.msra.mxu1 %v2276_v47 }
  0x41   : > { %784 = vmatprep.subr.bf16.mxu0 %v2277_v50  ;;  %825 = vmatprep.subr.bf16.mxu1 %v2279_v51 }
  0x44   : > { %785 = vmatpush2.bf16.msra.mxu0 %v2281_v53  ;;  %826 = vmatpush2.bf16.msra.mxu1 %v2282_v54 }
  0x45   : > { %786 = vmatprep.subr.bf16.mxu0 %v2283_v55  ;;  %827 = vmatprep.subr.bf16.mxu1 %v2285_v56  ;;  %v2035_v56 = vld [vmem:[%s2855_s3] ss:$0 sm:$0xff] }
  0x48   : > { %787 = vmatpush2.bf16.msra.mxu0 %v2287_v57  ;;  %828 = vmatpush2.bf16.msra.mxu1 %v2288_v58 }
  0x49   : > { %788 = vmatprep.subr.bf16.mxu0 %v2289_v59  ;;  %829 = vmatprep.subr.bf16.mxu1 %v2291_v60 }
  0x4c   : > { %789 = vmatpush2.bf16.msra.mxu0 %v2293_v61  ;;  %830 = vmatpush2.bf16.msra.mxu1 %v2294_v62 }
  0x4d   : > { %790 = vmatprep.subr.bf16.mxu0 %v2295_v63  ;;  %831 = vmatprep.subr.bf16.mxu1 %v2297_v1 }
  0x50   : > { %791 = vmatpush2.bf16.msra.mxu0 %v2299_v2  ;;  %832 = vmatpush2.bf16.msra.mxu1 %v2300_v3 }
  0x51   : > { %2114 = vmatprep.subr.bf16.mxu0 %v2301_v5  ;;  %2136 = vmatprep.subr.bf16.mxu1 %v2302_v6 }
  0x53   : > { %793 = vmatmul.mubr.bf16.vlgmr.msra.gmra.mxu0 %v374_v8  ;;  %834 = vmatmul.mubr.bf16.vlgmr.msra.gmra.mxu1 %v374_v8 }
  0x54   : > { %2115 = vmatpush3.bf16.msra.mxu0 %v2303_v7  ;;  %2137 = vmatpush3.bf16.msra.mxu1 %v2304_v9 }
  0x55   : > { %2116 = vmatprep.subr.bf16.mxu0 %v2305_v10  ;;  %2138 = vmatprep.subr.bf16.mxu1 %v2306_v11 }
  0x58   : > { %2117 = vmatpush3.bf16.msra.mxu0 %v2307_v12  ;;  %2139 = vmatpush3.bf16.msra.mxu1 %v2308_v13 }
  0x59   : > { %2118 = vmatprep.subr.bf16.mxu0 %v2309_v14  ;;  %2140 = vmatprep.subr.bf16.mxu1 %v2310_v15 }
  0x5c   : > { %2119 = vmatpush3.bf16.msra.mxu0 %v2311_v16  ;;  %2141 = vmatpush3.bf16.msra.mxu1 %v2312_v17 }
  0x5d   : > { %2120 = vmatprep.subr.bf16.mxu0 %v2313_v18  ;;  %2142 = vmatprep.subr.bf16.mxu1 %v2314_v19 }
  0x60   : > { %2121 = vmatpush3.bf16.msra.mxu0 %v2315_v20  ;;  %2143 = vmatpush3.bf16.msra.mxu1 %v2316_v21 }
  0x61   : > { %2122 = vmatprep.subr.bf16.mxu0 %v2317_v22  ;;  %2144 = vmatprep.subr.bf16.mxu1 %v2318_v23 }
  0x64   : > { %2123 = vmatpush3.bf16.msra.mxu0 %v2319_v24  ;;  %2145 = vmatpush3.bf16.msra.mxu1 %v2320_v25 }
  0x65   : > { %2124 = vmatprep.subr.bf16.mxu0 %v2321_v26  ;;  %2146 = vmatprep.subr.bf16.mxu1 %v2322_v27 }
  0x68   : > { %2125 = vmatpush3.bf16.msra.mxu0 %v2323_v28  ;;  %2147 = vmatpush3.bf16.msra.mxu1 %v2324_v29 }
  0x69   : > { %2126 = vmatprep.subr.bf16.mxu0 %v2325_v30  ;;  %2148 = vmatprep.subr.bf16.mxu1 %v2326_v31 }
  0x6c   : > { %2127 = vmatpush3.bf16.msra.mxu0 %v2327_v32  ;;  %2149 = vmatpush3.bf16.msra.mxu1 %v2328_v33 }
  0x6d   : > { %2128 = vmatprep.subr.bf16.mxu0 %v2329_v34  ;;  %2150 = vmatprep.subr.bf16.mxu1 %v2330_v35 }
  0x70   : > { %2129 = vmatpush3.bf16.msra.mxu0 %v2331_v36  ;;  %2151 = vmatpush3.bf16.msra.mxu1 %v2332_v37 }
 0x113   : > { %v794_v38 = vpop.f32.mrf.mxu0  ;;  %v835_v39 = vpop.f32.mrf.mxu1 }
 0x114   : > { %v844_v40 = vmax.f32 %v835_v39, 0.0  ;;  %v842_v41 = vmax.f32 %v794_v38, 0.0 }
 0x115   : > { %v796_v42 = vpop.f32.mrf.mxu0  ;;  %v837_v43 = vpop.f32.mrf.mxu1 }
 0x116   : > { %v843_v44 = vmax.f32 %v796_v42, 0.0  ;;  %v845_v45 = vmax.f32 %v837_v43, 0.0  ;;  %v848_v46 = vpack.c.bf16 %v844_v40, %v844_v40  ;;  %v846_v51 = vpack.c.bf16 %v842_v41, %v842_v41 }
 0x117   : > { %v798_v47 = vpop.f32.mrf.mxu0  ;;  %v839_v48 = vpop.f32.mrf.mxu1 }
 0x118   : > { %v847_v49 = vpack.c.bf16 %v843_v44, %v843_v44  ;;  %v849_v50 = vpack.c.bf16 %v845_v45, %v845_v45 }
 0x119   : > { %v799_v52 = vpop.f32.mrf.mxu0  ;;  %v840_v53 = vpop.f32.mrf.mxu1 }
 0x11a   : > { %1145 = vmatprep.mubr.bf16.mxu0 %v847_v49  ;;  %1185 = vmatprep.mubr.bf16.mxu1 %v849_v50 }
 0x11b   : > { %1146 = vmatmul.mubr.bf16.vlgmr.msra.gmra.mxu0 %v846_v51  ;;  %1186 = vmatmul.mubr.bf16.vlgmr.msra.gmra.mxu1 %v848_v46 }
 0x1db   : > { %v2130_v54 = vpop.f32.mrf.mxu0  ;;  %v2152_v55 = vpop.f32.mrf.mxu1 }
 0x1dd   : > { %v2131_v57 = vpop.f32.mrf.mxu0  ;;  %v2153_v58 = vpop.f32.mrf.mxu1 }
 0x1de   : > { %v2132_v59 = vadd.f32 %v2131_v57, %v2130_v54  ;;  %v2154_v63 = vadd.f32 %v2153_v58, %v2152_v55 }
 0x1df   : > { %v2133_v60 = vpop.f32.mrf.mxu0  ;;  %v2155_v61 = vpop.f32.mrf.mxu1 }
 0x1e0   : > { %v1148_v62 = vadd.f32 %v2132_v59, %v2035_v56 }
 0x1e1   : > { %v2134_v0 = vpop.f32.mrf.mxu0  ;;  %v2156_v1 = vpop.f32.mrf.mxu1 }
 0x1e2   : > { %v1188_v2 = vadd.f32 %v2154_v63, %v1148_v62 }
 0x1e4   : > { %1193 = vst [vmem:[%s2859_s7] sm:$0xff] %v1188_v2 }
 0x1e5 PF: > { %v2333_v3 = vld [vmem:[%s2472_s13 + $0x74] ss:$8 sps:$4 sm:$0xff]   ;;  %v2335_v4 = vld [vmem:[%s2472_s13 + $0x70] ss:$8 sps:$4 sm:$0xff]   ;;  %v2405_v5 = vmov 0   ;;  %v2357_v20 = vld [vmem:[%s2467_s10] sm:$0xff]  }
 0x1e6   : > { %1386 = vmatprep.mubr.bf16.mxu0 %v2405_v5  ;;  %1354 = vmatprep.subr.bf16.mxu0 %v2333_v3  ;;  %v2336_v6 = vld [vmem:[%s2472_s13 + $0x64] ss:$8 sps:$4 sm:$0xff]   ;;  %v2338_v7 = vld [vmem:[%s2472_s13 + $0x60] ss:$8 sps:$4 sm:$0xff]   ;;  %v2339_v8 = vld [vmem:[%s2472_s13 + $0x54] ss:$8 sps:$4 sm:$0xff]  }
 0x1e7   : > { %1355 = vmatpush1.bf16.msra.mxu0 %v2335_v4  ;;  %v2341_v9 = vld [vmem:[%s2472_s13 + $0x50] ss:$8 sps:$4 sm:$0xff]   ;;  %v2342_v10 = vld [vmem:[%s2472_s13 + $0x44] ss:$8 sps:$4 sm:$0xff]   ;;  %v2344_v11 = vld [vmem:[%s2472_s13 + $0x40] ss:$8 sps:$4 sm:$0xff]  }
 0x1e8   : > { %1356 = vmatprep.subr.bf16.mxu0 %v2336_v6  ;;  %v2345_v12 = vld [vmem:[%s2472_s13 + $0x34] ss:$8 sps:$4 sm:$0xff]   ;;  %v2347_v13 = vld [vmem:[%s2472_s13 + $0x30] ss:$8 sps:$4 sm:$0xff]   ;;  %v2348_v14 = vld [vmem:[%s2472_s13 + $0x24] ss:$8 sps:$4 sm:$0xff]  }
 0x1e9   : > { %v2350_v15 = vld [vmem:[%s2472_s13 + $0x20] ss:$8 sps:$4 sm:$0xff]   ;;  %v2351_v16 = vld [vmem:[%s2472_s13 + $0x14] ss:$8 sps:$4 sm:$0xff]   ;;  %v2353_v17 = vld [vmem:[%s2472_s13 + $0x10] ss:$8 sps:$4 sm:$0xff]  }
 0x1ea   : > { %v2354_v18 = vld [vmem:[%s2472_s13 + $0x4] ss:$8 sps:$4 sm:$0xff]   ;;  %v2356_v19 = vld [vmem:[%s2472_s13] ss:$8 sps:$4 sm:$0xff]   ;;  %v2359_v22 = vld [vmem:[%s2467_s10 + $0x10] sm:$0xff]   ;;  %vm1692_vm0 = vcmask 1041409  }
 0x1eb   : > { %1357 = vmatpush1.bf16.msra.mxu0 %v2338_v7  ;;  %v2358_v21 = vld [vmem:[%s2467_s10 + $0x8] sm:$0xff]   ;;  %v2360_v23 = vld [vmem:[%s2467_s10 + $0x18] sm:$0xff]   ;;  %v2361_v24 = vld [vmem:[%s2467_s10 + $0x20] sm:$0xff]   ;;  %vm1694_vm1 = vcmask 1042434   ;;  %vm1696_vm2 = vcmask 1043459   ;;  %vm1698_vm3 = vcmask 1044484  }
 0x1ec   : > { %1358 = vmatprep.subr.bf16.mxu0 %v2339_v8  ;;  %v2362_v25 = vld [vmem:[%s2467_s10 + $0x28] sm:$0xff]   ;;  %v2363_v26 = vld [vmem:[%s2467_s10 + $0x30] sm:$0xff]   ;;  %v2364_v27 = vld [vmem:[%s2467_s10 + $0x38] sm:$0xff]   ;;  %vm1700_vm4 = vcmask 1045509   ;;  %vm1702_vm5 = vcmask 1046534   ;;  %vm1704_vm6 = vcmask 1047559  }
 0x1ed   : > { %v2365_v28 = vld [vmem:[%s2477_s16 + $0x78] sm:$0xff]   ;;  %v2367_v30 = vld [vmem:[%s2477_s16 + $0x70] sm:$0xff]   ;;  %v2369_v32 = vld [vmem:[%s2477_s16 + $0x68] sm:$0xff]  }
 0x1ee   : > { %v2366_v29 = vld [vmem:[%s2477_s16 + $0x38] sm:$0xff]   ;;  %2158 = vmatprep.subr.bf16.mxu1 %v2365_v28  ;;  %v2368_v31 = vld [vmem:[%s2477_s16 + $0x30] sm:$0xff]   ;;  %v2370_v33 = vld [vmem:[%s2477_s16 + $0x28] sm:$0xff]  }
 0x1ef   : > { %1359 = vmatpush1.bf16.msra.mxu0 %v2341_v9  ;;  %2159 = vmatpush3.bf16.msra.mxu1 %v2366_v29  ;;  %v2371_v34 = vld [vmem:[%s2477_s16 + $0x60] sm:$0xff]   ;;  %v2373_v36 = vld [vmem:[%s2477_s16 + $0x58] sm:$0xff]   ;;  %v2375_v38 = vld [vmem:[%s2477_s16 + $0x50] sm:$0xff]  }
 0x1f0   : > { %1360 = vmatprep.subr.bf16.mxu0 %v2342_v10  ;;  %2160 = vmatprep.subr.bf16.mxu1 %v2367_v30  ;;  %v2372_v35 = vld [vmem:[%s2477_s16 + $0x20] sm:$0xff]   ;;  %v2374_v37 = vld [vmem:[%s2477_s16 + $0x18] sm:$0xff]   ;;  %v2376_v39 = vld [vmem:[%s2477_s16 + $0x10] sm:$0xff]  }
 0x1f1   : > { %v2377_v40 = vld [vmem:[%s2477_s16 + $0x48] sm:$0xff]   ;;  %v2379_v42 = vld [vmem:[%s2477_s16 + $0x40] sm:$0xff]  }
 0x1f2   : > { %v2378_v41 = vld [vmem:[%s2477_s16 + $0x8] sm:$0xff]   ;;  %v2380_v43 = vld [vmem:[%s2477_s16] sm:$0xff]  }
 0x1f3   : > { %1361 = vmatpush1.bf16.msra.mxu0 %v2344_v11  ;;  %2161 = vmatpush3.bf16.msra.mxu1 %v2368_v31 }
 0x1f4   : > { %1362 = vmatprep.subr.bf16.mxu0 %v2345_v12  ;;  %2162 = vmatprep.subr.bf16.mxu1 %v2369_v32 }
 0x1f7   : > { %1363 = vmatpush1.bf16.msra.mxu0 %v2347_v13  ;;  %2163 = vmatpush3.bf16.msra.mxu1 %v2370_v33 }
 0x1f8   : > { %1364 = vmatprep.subr.bf16.mxu0 %v2348_v14  ;;  %2164 = vmatprep.subr.bf16.mxu1 %v2371_v34 }
 0x1fb   : > { %1365 = vmatpush1.bf16.msra.mxu0 %v2350_v15  ;;  %2165 = vmatpush3.bf16.msra.mxu1 %v2372_v35 }
 0x1fc   : > { %1366 = vmatprep.subr.bf16.mxu0 %v2351_v16  ;;  %2166 = vmatprep.subr.bf16.mxu1 %v2373_v36 }
 0x1ff   : > { %1367 = vmatpush1.bf16.msra.mxu0 %v2353_v17  ;;  %2167 = vmatpush3.bf16.msra.mxu1 %v2374_v37 }
 0x200   : > { %1368 = vmatprep.subr.bf16.mxu0 %v2354_v18  ;;  %2168 = vmatprep.subr.bf16.mxu1 %v2375_v38 }
 0x203   : > { %1369 = vmatpush1.bf16.msra.mxu0 %v2356_v19  ;;  %2169 = vmatpush3.bf16.msra.mxu1 %v2376_v39 }
 0x204   : > { %2170 = vmatprep.subr.bf16.mxu1 %v2377_v40 }
 0x206   : > { %1387 = vmatmul.mubr.bf16.vlgmr.msra.gmra.mxu0 %v2357_v20 }
 0x207   : > { %1396 = vmatprep.mubr.bf16.mxu0 %v2405_v5  ;;  %2171 = vmatpush3.bf16.msra.mxu1 %v2378_v41 }
 0x208   : > { %2172 = vmatprep.subr.bf16.mxu1 %v2379_v42 }
 0x20b   : > { %2173 = vmatpush3.bf16.msra.mxu1 %v2380_v43 }
 0x20e   : > { %1397 = vmatmul.mubr.bf16.gmra.mxu0 %v2358_v21 }
 0x20f   : > { %1406 = vmatprep.mubr.bf16.mxu0 %v2405_v5 }
 0x216   : > { %1407 = vmatmul.mubr.bf16.gmra.mxu0 %v2359_v22 }
 0x217   : > { %1416 = vmatprep.mubr.bf16.mxu0 %v2405_v5 }
 0x21e   : > { %1417 = vmatmul.mubr.bf16.gmra.mxu0 %v2360_v23 }
 0x21f   : > { %1426 = vmatprep.mubr.bf16.mxu0 %v2405_v5 }
 0x226   : > { %1427 = vmatmul.mubr.bf16.gmra.mxu0 %v2361_v24 }
 0x227   : > { %1436 = vmatprep.mubr.bf16.mxu0 %v2405_v5 }
 0x22e   : > { %1437 = vmatmul.mubr.bf16.gmra.mxu0 %v2362_v25 }
 0x22f   : > { %1446 = vmatprep.mubr.bf16.mxu0 %v2405_v5 }
 0x236   : > { %1447 = vmatmul.mubr.bf16.gmra.mxu0 %v2363_v26 }
 0x237   : > { %1456 = vmatprep.mubr.bf16.mxu0 %v2405_v5 }
 0x23e   : > { %1457 = vmatmul.mubr.bf16.gmra.mxu0 %v2364_v27 }
 0x2c6   : > { %v1388_v44 = vpop.f32.mrf.mxu0 }
 0x2c7   : > { %v1467_v56 = vmax.f32 %v1388_v44, 0.0 }
 0x2c8   : > { %v1390_v45 = vpop.f32.mrf.mxu0 }
 0x2c9   : > { %v1468_v58 = vmax.f32 %v1390_v45, 0.0 }
 0x2ca   : > { %v1392_v46 = vpop.f32.mrf.mxu0 }
 0x2cb   : > { %v1469_v53 = vmax.f32 %v1392_v46, 0.0 }
 0x2cc   : > { %v1394_v47 = vpop.f32.mrf.mxu0 }
 0x2cd   : > { %v1470_v55 = vmax.f32 %v1394_v47, 0.0  ;;  %v1499_v59 = vmax.f32 %v1467_v56, %v1469_v53 }
 0x2ce   : > { %v1398_v48 = vpop.f32.mrf.mxu0 }
 0x2cf   : > { %v1506_v61 = vmax.f32 %v1468_v58, %v1470_v55  ;;  %v1500_v63 = vrot.slane %v1499_v59, 4  ;;  %v1471_v6 = vmax.f32 %v1398_v48, 0.0 }
 0x2d0   : > { %v1400_v49 = vpop.f32.mrf.mxu0 }
 0x2d1   : > { %v1507_v1 = vrot.slane %v1506_v61, 4  ;;  %v1501_v5 = vmax.f32 %v1499_v59, %v1500_v63  ;;  %v1472_v9 = vmax.f32 %v1400_v49, 0.0 }
 0x2d2   : > { %v1402_v50 = vpop.f32.mrf.mxu0 }
 0x2d3   : > { %v1473_v2 = vmax.f32 %v1402_v50, 0.0  ;;  %v1508_v8 = vmax.f32 %v1506_v61, %v1507_v1  ;;  %v1502_v13 = vrot.slane %v1501_v5, 2 }
 0x2d4   : > { %v1404_v51 = vpop.f32.mrf.mxu0 }
 0x2d5   : > { %v1474_v4 = vmax.f32 %v1404_v51, 0.0  ;;  %v1513_v10 = vmax.f32 %v1471_v6, %v1473_v2  ;;  %v1509_v15 = vrot.slane %v1508_v8, 2  ;;  %v1503_v24 = vmax.f32 %v1501_v5, %v1502_v13 }
 0x2d6   : > { %v1408_v52 = vpop.f32.mrf.mxu0 }
 0x2d7   : > { %v1520_v12 = vmax.f32 %v1472_v9, %v1474_v4  ;;  %v1514_v18 = vrot.slane %v1513_v10, 4  ;;  %v1475_v21 = vmax.f32 %v1408_v52, 0.0  ;;  %v1510_v28 = vmax.f32 %v1508_v8, %v1509_v15 }
 0x2d8   : > { %v1410_v54 = vpop.f32.mrf.mxu0  ;;  %v1504_v43 = vrot.slane %v1503_v24, 1 }
 0x2d9   : > { %v1521_v20 = vrot.slane %v1520_v12, 4  ;;  %v1476_v22 = vmax.f32 %v1410_v54, 0.0  ;;  %v1515_v36 = vmax.f32 %v1513_v10, %v1514_v18  ;;  %v1511_v44 = vrot.slane %v1510_v28, 1 }
 0x2da   : > { %v1412_v57 = vpop.f32.mrf.mxu0 }
 0x2db   : > { %v1477_v16 = vmax.f32 %v1412_v57, 0.0  ;;  %v1522_v37 = vmax.f32 %v1520_v12, %v1521_v20  ;;  %v1516_v49 = vrot.slane %v1515_v36, 2  ;;  %v1505_v57 = vmax.f32 %v1503_v24, %v1504_v43 }
 0x2dc   : > { %v1414_v60 = vpop.f32.mrf.mxu0  ;;  %v1512_v58 = vmax.f32 %v1510_v28, %v1511_v44 }
 0x2dd   : > { %v1478_v17 = vmax.f32 %v1414_v60, 0.0  ;;  %v1527_v29 = vmax.f32 %v1475_v21, %v1477_v16  ;;  %v1523_v50 = vrot.slane %v1522_v37, 2  ;;  %v1517_v2 = vmax.f32 %v1515_v36, %v1516_v49 }
 0x2de   : > { %v1418_v62 = vpop.f32.mrf.mxu0  ;;  %v1612_v10 = vpack.c.bf16 %v1505_v57, %v1505_v57 }
 0x2df   : > { %v1534_v30 = vmax.f32 %v1476_v22, %v1478_v17  ;;  %v1479_v31 = vmax.f32 %v1418_v62, 0.0  ;;  %v1528_v45 = vrot.slane %v1527_v29, 4  ;;  %v1518_v18 = vrot.slane %v1517_v2, 1 }
 0x2e0   : > { %v1420_v0 = vpop.f32.mrf.mxu0  ;;  %v2819_v36 = vunpack.c.l.b16 %v1612_v10 }
 0x2e1   : > { %v1480_v32 = vmax.f32 %v1420_v0, 0.0  ;;  %v1535_v46 = vrot.slane %v1534_v30, 4  ;;  %v1529_v59 = vmax.f32 %v1527_v29, %v1528_v45 }
 0x2e2   : > { %v1422_v3 = vpop.f32.mrf.mxu0 }
 0x2e3   : > { %v1481_v23 = vmax.f32 %v1422_v3, 0.0  ;;  %v1536_v60 = vmax.f32 %v1534_v30, %v1535_v46  ;;  %v1524_v3 = vmax.f32 %v1522_v37, %v1523_v50  ;;  %v1530_v12 = vrot.slane %v1529_v59, 2 }
 0x2e4   : > { %v1424_v7 = vpop.f32.mrf.mxu0 }
 0x2e5   : > { %v1482_v25 = vmax.f32 %v1424_v7, 0.0  ;;  %v1541_v38 = vmax.f32 %v1479_v31, %v1481_v23  ;;  %v1537_v13 = vrot.slane %v1536_v60, 2 }
 0x2e6   : > { %v1428_v11 = vpop.f32.mrf.mxu0 }
 0x2e7   : > { %v1483_v33 = vmax.f32 %v1428_v11, 0.0  ;;  %v1548_v39 = vmax.f32 %v1480_v32, %v1482_v25  ;;  %v1542_v51 = vrot.slane %v1541_v38, 4  ;;  %v1613_v11 = vpack.c.bf16 %v1512_v58, %v1512_v58 }
 0x2e8   : > { %v1430_v14 = vpop.f32.mrf.mxu0  ;;  %v1538_v31 = vmax.f32 %v1536_v60, %v1537_v13 }
 0x2e9   : > { %v1484_v40 = vmax.f32 %v1430_v14, 0.0  ;;  %v1549_v52 = vrot.slane %v1548_v39, 4  ;;  %v1543_v4 = vmax.f32 %v1541_v38, %v1542_v51  ;;  %v2821_v37 = vunpack.c.l.b16 %v1613_v11 }
 0x2ea   : > { %v1432_v19 = vpop.f32.mrf.mxu0  ;;  %v1539_v49 = vrot.slane %v1538_v31, 1 }
 0x2eb   : > { %v1485_v26 = vmax.f32 %v1432_v19, 0.0  ;;  %v1550_v5 = vmax.f32 %v1548_v39, %v1549_v52  ;;  %v1525_v19 = vrot.slane %v1524_v3, 1  ;;  %v1544_v22 = vrot.slane %v1543_v4, 2 }
 0x2ec   : > { %v1434_v27 = vpop.f32.mrf.mxu0 }
 0x2ed   : > { %v1486_v34 = vmax.f32 %v1434_v27, 0.0  ;;  %v1555_v41 = vmax.f32 %v1483_v33, %v1485_v26  ;;  %v1551_v23 = vrot.slane %v1550_v5, 2  ;;  %v1531_v27 = vmax.f32 %v1529_v59, %v1530_v12 }
 0x2ee   : > { %v1438_v35 = vpop.f32.mrf.mxu0  ;;  %v1526_v45 = vmax.f32 %v1524_v3, %v1525_v19  ;;  %v1540_v12 = vmax.f32 %v1538_v31, %v1539_v49 }
 0x2ef   : > { %v1562_v47 = vmax.f32 %v1484_v40, %v1486_v34  ;;  %v1556_v53 = vrot.slane %v1555_v41, 4  ;;  %v1487_v54 = vmax.f32 %v1438_v35, 0.0  ;;  %v1519_v40 = vmax.f32 %v1517_v2, %v1518_v18 }
 0x2f0   : > { %v1440_v42 = vpop.f32.mrf.mxu0  ;;  %v1532_v46 = vrot.slane %v1531_v27, 1  ;;  %v1615_v19 = vpack.c.bf16 %v1526_v45, %v1526_v45 }
 0x2f1   : > { %v1563_v61 = vrot.slane %v1562_v47, 4  ;;  %v1488_v62 = vmax.f32 %v1440_v42, 0.0  ;;  %v1557_v6 = vmax.f32 %v1555_v41, %v1556_v53  ;;  %v1545_v41 = vmax.f32 %v1543_v4, %v1544_v22 }
 0x2f2   : > { %v1442_v48 = vpop.f32.mrf.mxu0  ;;  %v1552_v42 = vmax.f32 %v1550_v5, %v1551_v23  ;;  %v1533_v3 = vmax.f32 %v1531_v27, %v1532_v46  ;;  %v1614_v11 = vpack.c.bf16 %v1519_v40, %v1519_v40 }
 0x2f3   : > { %v1489_v55 = vmax.f32 %v1442_v48, 0.0  ;;  %v1564_v14 = vmax.f32 %v1562_v47, %v1563_v61  ;;  %v1558_v24 = vrot.slane %v1557_v6, 2  ;;  %v1546_v58 = vrot.slane %v1545_v41, 1 }
 0x2f4   : > { %v1444_v56 = vpop.f32.mrf.mxu0  ;;  %v1553_v59 = vrot.slane %v1552_v42, 1  ;;  %v1678_v27 = vunpack.c.l.b16 %v1614_v11 }
 0x2f5   : > { %v1569_v63 = vmax.f32 %v1487_v54, %v1489_v55  ;;  %v1490_v0 = vmax.f32 %v1444_v56, 0.0  ;;  %v1565_v32 = vrot.slane %v1564_v14, 2  ;;  %v1559_v43 = vmax.f32 %v1557_v6, %v1558_v24 }
 0x2f6   : > { %v1448_v1 = vpop.f32.mrf.mxu0  ;;  %v1547_v13 = vmax.f32 %v1545_v41, %v1546_v58  ;;  %v1693_v45 = vsel %vm1692_vm0, %v1678_v27, %v2819_v36 }
 0x2f7   : > { %v1570_v7 = vrot.slane %v1569_v63, 4  ;;  %v1576_v8 = vmax.f32 %v1488_v62, %v1490_v0  ;;  %v1491_v20 = vmax.f32 %v1448_v1, 0.0  ;;  %v1566_v50 = vmax.f32 %v1564_v14, %v1565_v32 }
 0x2f8   : > { %v1450_v9 = vpop.f32.mrf.mxu0  ;;  %v1560_v60 = vrot.slane %v1559_v43, 1  ;;  %v1554_v14 = vmax.f32 %v1552_v42, %v1553_v59 }
 0x2f9   : > { %v1571_v15 = vmax.f32 %v1569_v63, %v1570_v7  ;;  %v1577_v16 = vrot.slane %v1576_v8, 4  ;;  %v1492_v28 = vmax.f32 %v1450_v9, 0.0  ;;  %v1567_v4 = vrot.slane %v1566_v50, 1 }
 0x2fa   : > { %v1452_v17 = vpop.f32.mrf.mxu0  ;;  %v1619_v31 = vpack.c.bf16 %v1554_v14, %v1554_v14 }
 0x2fb   : > { %v1493_v21 = vmax.f32 %v1452_v17, 0.0  ;;  %v1578_v25 = vmax.f32 %v1576_v8, %v1577_v16  ;;  %v1572_v33 = vrot.slane %v1571_v15, 2 }
 0x2fc   : > { %v1454_v26 = vpop.f32.mrf.mxu0  ;;  %v1683_v49 = vunpack.c.l.b16 %v1619_v31 }
 0x2fd   : > { %v1583_v29 = vmax.f32 %v1491_v20, %v1493_v21  ;;  %v1494_v30 = vmax.f32 %v1454_v26, 0.0  ;;  %v1579_v34 = vrot.slane %v1578_v25, 2  ;;  %v1573_v51 = vmax.f32 %v1571_v15, %v1572_v33 }
 0x2fe   : > { %v1458_v35 = vpop.f32.mrf.mxu0  ;;  %v1561_v15 = vmax.f32 %v1559_v43, %v1560_v60  ;;  %v1616_v20 = vpack.c.bf16 %v1533_v3, %v1533_v3  ;;  %v1568_v21 = vmax.f32 %v1566_v50, %v1567_v4 }
 0x2ff   : > { %v1584_v38 = vrot.slane %v1583_v29, 4  ;;  %v1590_v39 = vmax.f32 %v1492_v28, %v1494_v30  ;;  %v1580_v52 = vmax.f32 %v1578_v25, %v1579_v34  ;;  %v1495_v56 = vmax.f32 %v1458_v35, 0.0 }
 0x300   : > { %v1460_v44 = vpop.f32.mrf.mxu0  ;;  %v1574_v5 = vrot.slane %v1573_v51, 1  ;;  %v1617_v28 = vpack.c.bf16 %v1540_v12, %v1540_v12  ;;  %v1620_v32 = vpack.c.bf16 %v1561_v15, %v1561_v15  ;;  %v1679_v35 = vunpack.c.l.b16 %v1615_v19 }
 0x301   : > { %v1585_v47 = vmax.f32 %v1583_v29, %v1584_v38  ;;  %v1591_v48 = vrot.slane %v1590_v39, 4  ;;  %v1496_v61 = vmax.f32 %v1460_v44, 0.0  ;;  %v1581_v6 = vrot.slane %v1580_v52, 1 }
 0x302   : > { %v1462_v53 = vpop.f32.mrf.mxu0  ;;  %v1575_v22 = vmax.f32 %v1573_v51, %v1574_v5  ;;  %v1618_v29 = vpack.c.bf16 %v1547_v13, %v1547_v13  ;;  %v1680_v38 = vunpack.c.l.b16 %v1616_v20  ;;  %v1681_v46 = vunpack.c.l.b16 %v1617_v28  ;;  %v1611_v13 = vld [vmem:[%s2859_s7] sm:$0xff] }
 0x303   : > { %v1586_v54 = vrot.slane %v1585_v47, 2  ;;  %v1592_v55 = vmax.f32 %v1590_v39, %v1591_v48  ;;  %v1497_v57 = vmax.f32 %v1462_v53, 0.0  ;;  %v1582_v23 = vmax.f32 %v1580_v52, %v1581_v6 }
 0x304   : > { %v1464_v62 = vpop.f32.mrf.mxu0  ;;  %v1621_v39 = vpack.c.bf16 %v1568_v21, %v1568_v21  ;;  %v1622_v40 = vpack.c.bf16 %v1575_v22, %v1575_v22  ;;  %v1684_v50 = vunpack.c.l.b16 %v1620_v32 }
 0x305   : > { %v1587_v63 = vmax.f32 %v1585_v47, %v1586_v54  ;;  %v1593_v0 = vrot.slane %v1592_v55, 2  ;;  %v1597_v1 = vmax.f32 %v1495_v56, %v1497_v57  ;;  %v1498_v2 = vmax.f32 %v1464_v62, 0.0 }
 0x306   : > { %v1623_v41 = vpack.c.bf16 %v1582_v23, %v1582_v23  ;;  %v1682_v47 = vunpack.c.l.b16 %v1618_v29  ;;  %v1685_v53 = vunpack.c.l.b16 %v1621_v39  ;;  %v1686_v54 = vunpack.c.l.b16 %v1622_v40 }
 0x307   : > { %v1588_v7 = vrot.slane %v1587_v63, 1  ;;  %v1594_v8 = vmax.f32 %v1592_v55, %v1593_v0  ;;  %v1598_v9 = vrot.slane %v1597_v1, 4  ;;  %v1604_v10 = vmax.f32 %v1496_v61, %v1498_v2 }
 0x308   : > { %v1706_v55 = vsel %vm1692_vm0, %v1679_v35, %v2821_v37  ;;  %v1695_v56 = vsel %vm1694_vm1, %v1680_v38, %v1693_v45  ;;  %v1687_v60 = vunpack.c.l.b16 %v1623_v41 }
 0x309   : > { %v1595_v16 = vrot.slane %v1594_v8, 1  ;;  %v1599_v17 = vmax.f32 %v1597_v1, %v1598_v9  ;;  %v1605_v18 = vrot.slane %v1604_v10, 4  ;;  %v1589_v24 = vmax.f32 %v1587_v63, %v1588_v7 }
 0x30a   : > { %v1707_v36 = vsel %vm1694_vm1, %v1681_v46, %v1706_v55  ;;  %v1697_v62 = vsel %vm1696_vm2, %v1682_v47, %v1695_v56 }
 0x30b   : > { %v1600_v25 = vrot.slane %v1599_v17, 2  ;;  %v1606_v26 = vmax.f32 %v1604_v10, %v1605_v18  ;;  %v1596_v30 = vmax.f32 %v1594_v8, %v1595_v16  ;;  %v1624_v42 = vpack.c.bf16 %v1589_v24, %v1589_v24 }
 0x30c   : > { %v1708_v0 = vsel %vm1696_vm2, %v1683_v49, %v1707_v36  ;;  %v1699_v2 = vsel %vm1698_vm3, %v1684_v50, %v1697_v62 }
 0x30d   : > { %v1601_v33 = vmax.f32 %v1599_v17, %v1600_v25  ;;  %v1607_v34 = vrot.slane %v1606_v26, 2  ;;  %v1625_v48 = vpack.c.bf16 %v1596_v30, %v1596_v30  ;;  %v1688_v57 = vunpack.c.l.b16 %v1624_v42 }
 0x30e   : > { %v1709_v37 = vsel %vm1698_vm3, %v1685_v53, %v1708_v0  ;;  %v1701_v3 = vsel %vm1700_vm4, %v1686_v54, %v1699_v2 }
 0x30f   : > { %v1602_v43 = vrot.slane %v1601_v33, 1  ;;  %v1608_v44 = vmax.f32 %v1606_v26, %v1607_v34  ;;  %v1689_v61 = vunpack.c.l.b16 %v1625_v48  ;;  %v1710_v5 = vsel %vm1700_vm4, %v1687_v60, %v1709_v37 }
 0x310   : > { %v1703_v6 = vsel %vm1702_vm5, %v1688_v57, %v1701_v3 }
 0x311   : > { %v1603_v51 = vmax.f32 %v1601_v33, %v1602_v43  ;;  %v1609_v52 = vrot.slane %v1608_v44, 1  ;;  %v1711_v7 = vsel %vm1702_vm5, %v1689_v61, %v1710_v5 }
 0x313   : > { %v1626_v58 = vpack.c.bf16 %v1603_v51, %v1603_v51  ;;  %v1610_v59 = vmax.f32 %v1608_v44, %v1609_v52 }
 0x315   : > { %v1627_v63 = vpack.c.bf16 %v1610_v59, %v1610_v59  ;;  %v1690_v1 = vunpack.c.l.b16 %v1626_v58 }
 0x317   : > { %v1691_v4 = vunpack.c.l.b16 %v1627_v63  ;;  %v1705_v8 = vsel %vm1704_vm6, %v1690_v1, %v1703_v6 }
 0x318   : > { %v1713_v11 = vpack.c.b16 %v1705_v8, %v1705_v8 }
 0x319   : > { %v1712_v9 = vsel %vm1704_vm6, %v1691_v4, %v1711_v7 }
 0x31a   : > { %v1714_v10 = vpack.c.b16 %v1712_v9, %v1712_v9 }
 0x31c   : > { %1845 = vmatprep.mubr.bf16.mxu1 %v1714_v10 }
 0x31d   : > { %1846 = vmatmul.mubr.bf16.vlgmr.msra.gmra.mxu1 %v1713_v11 }
 0x3dd   : > { %v2174_v12 = vpop.f32.mrf.mxu1 }
 0x3df   : > { %v2175_v14 = vpop.f32.mrf.mxu1 }
 0x3e0   : > { %v2176_v15 = vadd.f32 %v2175_v14, %v2174_v12 }
 0x3e1   : > { %v2177_v16 = vpop.f32.mrf.mxu1 }
 0x3e2   : > { %v1853_v17 = vadd.f32 %v2176_v15, %v1611_v13 }
 0x3e3   : > { %v2178_v18 = vpop.f32.mrf.mxu1 }
 0x3e4   : > { %1854 = vst [vmem:[%s2859_s7] sm:$0xff] %v1853_v17 }
 0x3e5 PF: > { %s17_s26 = sadd.s32 1, %s2403_s26   ;;  %s2860_s24 = smov %s2399_s25 }
 0x3e6   : > { %p14_p6 = scmp.ge.s32.totalorder %s17_s26, 6   ;;  %s2861_s25 = smov %s2863_s27 }
 0x3e8   :  { %16 = sbr.rel (!%p14_p6) target bundleno = 2 (0x2), region = 91 }

</bundles_post_ra>
